<compile_context>
chip_gen: v7x
topology: tpu7x:2x2x1
jax: 0.10.0
libtpu: 0.0.40
codegen_flags: <defaults>
</compile_context>

<pallas_src>
import jax
import jax.numpy as jnp
from jax.experimental import pallas as pl
from jax.experimental.pallas import tpu as pltpu

# ---- problem sizes (small, consistent with the module) ----
T = 8          # fused sequence length (timesteps)
B = 8          # batch (8 -> fills all f32 sublanes of a vreg)
C = 32         # channel (Linear in_features)
N = 16         # memory rows (memory.size()[0])
M = 8          # memory word size (memory.size()[1])
LENGTHS = (M, 1, 1, 3, 1)      # key, beta, gate, shift, gamma
S = sum(LENGTHS)               # Linear out_features

_EPS = 1e-16
_COS_EPS = 1e-8


def _reader_kernel(feat_ref, w_ref, mem_ref, prev_ref, out_ref,
                   state_sc, memsq_sc):
    t = pl.program_id(0)
    mem = mem_ref[...]                                       # (N, M)

    # ---- one-time init: carried state + memory-row squared norms ----
    @pl.when(t == 0)
    def _init():
        state_sc[...] = prev_ref[...]                        # (B, N)
        memsq_sc[...] = jnp.sum(mem * mem, axis=1,
                                keepdims=True).T             # (1, N)

    # ---- self._net(features): Linear with bias folded into the matmul ----
    feats = feat_ref[0]                                      # (B, C+1), last col = 1
    params = jnp.dot(feats, w_ref[...],
                     preferred_element_type=jnp.float32)     # (B, S)

    # ---- _split_cols + parameter transforms ----
    key   = params[:, 0:M]                                   # (B, M)
    beta  = jax.nn.softplus(params[:, M:M + 1])              # (B, 1)
    gate  = jax.nn.sigmoid(params[:, M + 1:M + 2])           # (B, 1)
    shift = jax.nn.softmax(params[:, M + 2:M + 5], axis=1)   # (B, 3)
    gamma = 1.0 + jax.nn.softplus(params[:, M + 5:M + 6])    # (B, 1)

    prev_w = state_sc[...]                                   # (B, N)

    # ---- content addressing: softmax(beta * cosine_sim(key, memory)) ----
    dots = jax.lax.dot_general(key, mem, (((1,), (1,)), ((), ())),
                               preferred_element_type=jnp.float32)   # (B, N)
    key_sq = jnp.sum(key * key, axis=1, keepdims=True)               # (B, 1)
    denom_sq = jnp.maximum(key_sq * memsq_sc[...],
                           _COS_EPS * _COS_EPS)                      # (B, N)
    cos = dots * jax.lax.rsqrt(denom_sq)                             # one EUP rsqrt
    wc = jax.nn.softmax(beta * cos, axis=1)                          # (B, N)

    # ---- interpolation with previous state ----
    wg = gate * wc + (1.0 - gate) * prev_w                           # (B, N)

    # ---- 3-tap circular convolution (shift) ----
    # w_hat[i] = s0 * wg[i-1] + s1 * wg[i] + s2 * wg[i+1]   (circular)
    wg_m1 = jnp.concatenate([wg[:, N - 1:], wg[:, :N - 1]], axis=1)  # wg[i-1]
    wg_p1 = jnp.concatenate([wg[:, 1:], wg[:, :1]], axis=1)          # wg[i+1]
    w_hat = (shift[:, 0:1] * wg_m1 +
             shift[:, 1:2] * wg +
             shift[:, 2:3] * wg_p1)                                  # (B, N)

    # ---- sharpening: w = w_hat ** gamma / (sum + eps) ----
    w_pow = jnp.exp(gamma * jnp.log(w_hat + _EPS))                   # (B, N)
    weight = w_pow * pl.reciprocal(
        jnp.sum(w_pow, axis=1, keepdims=True) + _EPS)                # (B, N)

    # ---- memory.read(weight) = weight @ memory ----
    data = jnp.dot(weight, mem, preferred_element_type=jnp.float32)  # (B, M)

    # carry state; single concatenated output store (one epilogue)
    state_sc[...] = weight
    out_ref[0] = jnp.concatenate([data, weight], axis=1)             # (B, M+N)


def reader_forward_seq(features_seq, w_t, bias, memory, prev_w):
    """Fused Pallas _Reader forward over a sequence.

    Returns (data_seq (T,B,M), weight_seq (T,B,N)); weight_seq[-1] is the
    updated self._state.
    """
    T_, B_, C_ = features_seq.shape
    # Fold bias into the matmul: ones column on features, bias row on weight.
    feats_aug = jnp.concatenate(
        [features_seq, jnp.ones((T_, B_, 1), features_seq.dtype)], axis=-1)
    w_aug = jnp.concatenate([w_t, bias], axis=0)                     # (C+1, S)

    out = pl.pallas_call(
        _reader_kernel,
        out_shape=jax.ShapeDtypeStruct((T_, B_, M + N), jnp.float32),
        grid_spec=pltpu.PrefetchScalarGridSpec(
            num_scalar_prefetch=0,
            grid=(T_,),
            in_specs=[
                pl.BlockSpec((1, B_, C_ + 1), lambda t: (t, 0, 0)),   # per-step feats
                pl.BlockSpec((C_ + 1, S), lambda t: (0, 0)),          # resident weights
                pl.BlockSpec((N, M), lambda t: (0, 0)),               # resident memory
                pl.BlockSpec((B_, N), lambda t: (0, 0)),              # initial state
            ],
            out_specs=pl.BlockSpec((1, B_, M + N), lambda t: (t, 0, 0)),
            scratch_shapes=[
                pltpu.VMEM((B_, N), jnp.float32),   # carried head weighting
                pltpu.VMEM((1, N), jnp.float32),    # squared memory row norms
            ],
        ),
        compiler_params=pltpu.CompilerParams(
            # time axis carries the prev_w recurrence -> must stay "arbitrary"
            dimension_semantics=("arbitrary",)),
    )(feats_aug, w_aug, memory, prev_w)

    return out[..., :M], out[..., M:]


def reader_forward_seq_ref(features_seq, w_t, bias, memory, prev_w):
    """Pure-JAX reference with the original module's math (sqrt/div cosine,
    jnp.roll circular shift), scanned over the sequence."""
    def step(prev, feats):
        params = feats @ w_t + bias
        key = params[:, :M]
        beta = jax.nn.softplus(params[:, M:M + 1])
        gate = jax.nn.sigmoid(params[:, M + 1:M + 2])
        shift = jax.nn.softmax(params[:, M + 2:M + 5], axis=1)
        gamma = 1.0 + jax.nn.softplus(params[:, M + 5:M + 6])
        dots = key @ memory.T
        denom = jnp.maximum(
            jnp.linalg.norm(key, axis=1, keepdims=True) *
            jnp.linalg.norm(memory, axis=1, keepdims=True).T, _COS_EPS)
        wc = jax.nn.softmax(beta * (dots / denom), axis=1)
        wg = gate * wc + (1.0 - gate) * prev
        w_hat = (shift[:, 0:1] * jnp.roll(wg, 1, axis=1) +
                 shift[:, 1:2] * wg +
                 shift[:, 2:3] * jnp.roll(wg, -1, axis=1))
        w_pow = jnp.exp(gamma * jnp.log(w_hat + _EPS))
        weight = w_pow / (jnp.sum(w_pow, axis=1, keepdims=True) + _EPS)
        data = weight @ memory
        return weight, (data, weight)

    _, (data_seq, weight_seq) = jax.lax.scan(step, prev_w, features_seq)
    return data_seq, weight_seq


if __name__ == "__main__":
    root = jax.random.PRNGKey(0)
    k_feat, k_w, k_b, k_mem = jax.random.split(root, 4)

    # inputs: a sequence of feature batches
    features_seq = jax.random.normal(k_feat, (T, B, C), dtype=jnp.float32)

    # parameters (deterministic, matching the torch __init__ distributions)
    # xavier_uniform_(weight, gain=1.4): weight shape (S, C) -> stored transposed.
    limit = 1.4 * (6.0 / (C + S)) ** 0.5
    w_t = jax.random.uniform(k_w, (C, S), dtype=jnp.float32,
                             minval=-limit, maxval=limit)
    bias = 0.01 * jax.random.normal(k_b, (1, S), dtype=jnp.float32)

    # NTM memory matrix and reset head state (zero seed -> prev_w = zeros)
    memory = 1e-3 * jax.random.normal(k_mem, (N, M), dtype=jnp.float32) + 1e-2
    prev_w = jnp.zeros((B, N), dtype=jnp.float32)

    data_seq, weight_seq = reader_forward_seq(features_seq, w_t, bias,
                                              memory, prev_w)
    jax.block_until_ready((data_seq, weight_seq))

    data_ref, weight_ref = reader_forward_seq_ref(features_seq, w_t, bias,
                                                  memory, prev_w)
    assert data_seq.shape == (T, B, M) and weight_seq.shape == (T, B, N)
    assert jnp.allclose(data_seq, data_ref, atol=1e-5, rtol=1e-4)
    assert jnp.allclose(weight_seq, weight_ref, atol=1e-5, rtol=1e-4)
    assert jnp.allclose(jnp.sum(weight_seq, axis=-1), 1.0, atol=1e-4)

    print("KERNEL_OK")
</pallas_src>

<mosaic_0001>
module attributes {stable_mosaic.version = 11 : i64} {
  func.func @_reader_kernel(%arg0: i32, %arg1: memref<1x8x33xf32, #tpu.memory_space<vmem>>, %arg2: memref<33x14xf32, #tpu.memory_space<vmem>>, %arg3: memref<16x8xf32, #tpu.memory_space<vmem>>, %arg4: memref<8x16xf32, #tpu.memory_space<vmem>>, %arg5: memref<1x8x24xf32, #tpu.memory_space<vmem>>, %arg6: memref<8x16xf32, #tpu.memory_space<vmem>>, %arg7: memref<1x16xf32, #tpu.memory_space<vmem>>) attributes {dimension_semantics = [#tpu.dimension_semantics<arbitrary>], iteration_bounds = array<i64: 8>, scalar_prefetch = 0 : i64, scratch_operands = 2 : i64, tpu.core_type = #tpu.core_type<tc>, window_params = [{transform_indices = @transform_0, window_bounds = array<i64: 1, 8, 33>}, {pipeline_mode = #tpu.pipeline_mode<synchronous>, transform_indices = @transform_1, window_bounds = array<i64: 33, 14>}, {pipeline_mode = #tpu.pipeline_mode<synchronous>, transform_indices = @transform_2, window_bounds = array<i64: 16, 8>}, {pipeline_mode = #tpu.pipeline_mode<synchronous>, transform_indices = @transform_3, window_bounds = array<i64: 8, 16>}, {transform_indices = @transform_4, window_bounds = array<i64: 1, 8, 24>}]} {
    %c0 = arith.constant 0 : index
    %c0_0 = arith.constant 0 : index
    %0 = vector.load %arg3[%c0, %c0_0] : memref<16x8xf32, #tpu.memory_space<vmem>>, vector<16x8xf32>
    %c0_i32 = arith.constant 0 : i32
    %1 = arith.cmpi eq, %arg0, %c0_i32 : i32
    %2 = arith.extui %1 : i1 to i32
    %c0_i32_1 = arith.constant 0 : i32
    %3 = arith.cmpi ne, %2, %c0_i32_1 : i32
    scf.if %3 {
      %c0_36 = arith.constant 0 : index
      %c0_37 = arith.constant 0 : index
      %128 = vector.load %arg4[%c0_36, %c0_37] : memref<8x16xf32, #tpu.memory_space<vmem>>, vector<8x16xf32>
      %c0_38 = arith.constant 0 : index
      %c0_39 = arith.constant 0 : index
      %129 = vector.load %arg6[%c0_38, %c0_39] : memref<8x16xf32, #tpu.memory_space<vmem>>, vector<8x16xf32>
      tpu.vector_store %arg6[%c0_38, %c0_39], %128 {strides = array<i32>} : memref<8x16xf32, #tpu.memory_space<vmem>>, vector<8x16xf32>,
      %130 = arith.mulf %0, %0 : vector<16x8xf32>
      %cst_40 = arith.constant dense<0.000000e+00> : vector<16xf32>
      %131 = vector.multi_reduction <add>, %130, %cst_40 [1] : vector<16x8xf32> to vector<16xf32>
      %132 = vector.shape_cast %131 : vector<16xf32> to vector<16x1xf32>
      %133 = tpu.transpose %132, [1, 0] : vector<16x1xf32> -> vector<1x16xf32>
      %c0_41 = arith.constant 0 : index
      %c0_42 = arith.constant 0 : index
      %134 = vector.load %arg7[%c0_41, %c0_42] : memref<1x16xf32, #tpu.memory_space<vmem>>, vector<1x16xf32>
      tpu.vector_store %arg7[%c0_41, %c0_42], %133 {strides = array<i32>} : memref<1x16xf32, #tpu.memory_space<vmem>>, vector<1x16xf32>,
    } else {
    }
    %c0_2 = arith.constant 0 : index
    %c0_3 = arith.constant 0 : index
    %c0_4 = arith.constant 0 : index
    %4 = vector.load %arg1[%c0_2, %c0_3, %c0_4] : memref<1x8x33xf32, #tpu.memory_space<vmem>>, vector<1x8x33xf32>
    %5 = vector.shape_cast %4 : vector<1x8x33xf32> to vector<8x33xf32>
    %c0_5 = arith.constant 0 : index
    %c0_6 = arith.constant 0 : index
    %6 = vector.load %arg2[%c0_5, %c0_6] : memref<33x14xf32, #tpu.memory_space<vmem>>, vector<33x14xf32>
    %cst = arith.constant dense<0.000000e+00> : vector<8x14xf32>
    %7 = tpu.matmul %5, %6, %cst {dimension_numbers = #tpu.dot_dimension_numbers<[1], [0], [0], [1], [0, 0, 1, 1], [], []>} : vector<8x33xf32>, vector<33x14xf32>, vector<8x14xf32> -> vector<8x14xf32>
    %8 = vector.extract_strided_slice %7 {offsets = [0, 0], sizes = [8, 8], strides = [1, 1]} : vector<8x14xf32> to vector<8x8xf32>
    %9 = vector.extract_strided_slice %7 {offsets = [0, 8], sizes = [8, 1], strides = [1, 1]} : vector<8x14xf32> to vector<8x1xf32>
    %cst_7 = arith.constant 0.000000e+00 : f32
    %10 = vector.broadcast %cst_7 : f32 to vector<8x1xf32>
    %11 = arith.maximumf %9, %10 : vector<8x1xf32>
    %12 = vector.broadcast %cst_7 : f32 to vector<8x1xf32>
    %13 = arith.subf %9, %12 : vector<8x1xf32>
    %14 = arith.cmpf one, %13, %13 : vector<8x1xf32>
    %15 = vector.broadcast %cst_7 : f32 to vector<8x1xf32>
    %16 = arith.addf %9, %15 : vector<8x1xf32>
    %17 = math.absf %13 : vector<8x1xf32>
    %cst_8 = arith.constant 0.000000e+00 : f32
    %18 = vector.broadcast %cst_8 : f32 to vector<8x1xf32>
    %19 = arith.subf %18, %17 : vector<8x1xf32>
    %20 = math.exp %19 : vector<8x1xf32>
    %21 = math.log1p %20 : vector<8x1xf32>
    %22 = arith.addf %11, %21 : vector<8x1xf32>
    %23 = arith.select %14, %16, %22 : vector<8x1xi1>, vector<8x1xf32>
    %24 = vector.extract_strided_slice %7 {offsets = [0, 9], sizes = [8, 1], strides = [1, 1]} : vector<8x14xf32> to vector<8x1xf32>
    %25 = arith.negf %24 : vector<8x1xf32>
    %26 = math.exp %25 : vector<8x1xf32>
    %cst_9 = arith.constant 1.000000e+00 : f32
    %27 = vector.broadcast %cst_9 : f32 to vector<8x1xf32>
    %28 = arith.addf %27, %26 : vector<8x1xf32>
    %29 = arith.divf %27, %28 : vector<8x1xf32>
    %30 = vector.extract_strided_slice %7 {offsets = [0, 10], sizes = [8, 3], strides = [1, 1]} : vector<8x14xf32> to vector<8x3xf32>
    %cst_10 = arith.constant dense<0xFF800000> : vector<8xf32>
    %31 = vector.multi_reduction <maximumf>, %30, %cst_10 [1] : vector<8x3xf32> to vector<8xf32>
    %cst_11 = arith.constant 0xFF800000 : f32
    %32 = vector.broadcast %cst_11 : f32 to vector<8xf32>
    %33 = arith.maximumf %32, %31 : vector<8xf32>
    %34 = vector.shape_cast %33 : vector<8xf32> to vector<8x1xf32>
    %35 = vector.broadcast %34 : vector<8x1xf32> to vector<8x3xf32>
    %36 = arith.subf %30, %35 : vector<8x3xf32>
    %37 = math.exp %36 : vector<8x3xf32>
    %cst_12 = arith.constant dense<0.000000e+00> : vector<8xf32>
    %38 = vector.multi_reduction <add>, %37, %cst_12 [1] : vector<8x3xf32> to vector<8xf32>
    %39 = vector.shape_cast %38 : vector<8xf32> to vector<8x1xf32>
    %40 = vector.broadcast %39 : vector<8x1xf32> to vector<8x3xf32>
    %41 = arith.divf %37, %40 : vector<8x3xf32>
    %42 = vector.extract_strided_slice %7 {offsets = [0, 13], sizes = [8, 1], strides = [1, 1]} : vector<8x14xf32> to vector<8x1xf32>
    %cst_13 = arith.constant 0.000000e+00 : f32
    %43 = vector.broadcast %cst_13 : f32 to vector<8x1xf32>
    %44 = arith.maximumf %42, %43 : vector<8x1xf32>
    %45 = vector.broadcast %cst_13 : f32 to vector<8x1xf32>
    %46 = arith.subf %42, %45 : vector<8x1xf32>
    %47 = arith.cmpf one, %46, %46 : vector<8x1xf32>
    %48 = vector.broadcast %cst_13 : f32 to vector<8x1xf32>
    %49 = arith.addf %42, %48 : vector<8x1xf32>
    %50 = math.absf %46 : vector<8x1xf32>
    %cst_14 = arith.constant 0.000000e+00 : f32
    %51 = vector.broadcast %cst_14 : f32 to vector<8x1xf32>
    %52 = arith.subf %51, %50 : vector<8x1xf32>
    %53 = math.exp %52 : vector<8x1xf32>
    %54 = math.log1p %53 : vector<8x1xf32>
    %55 = arith.addf %44, %54 : vector<8x1xf32>
    %56 = arith.select %47, %49, %55 : vector<8x1xi1>, vector<8x1xf32>
    %cst_15 = arith.constant 1.000000e+00 : f32
    %57 = vector.broadcast %cst_15 : f32 to vector<8x1xf32>
    %58 = arith.addf %57, %56 : vector<8x1xf32>
    %c0_16 = arith.constant 0 : index
    %c0_17 = arith.constant 0 : index
    %59 = vector.load %arg6[%c0_16, %c0_17] : memref<8x16xf32, #tpu.memory_space<vmem>>, vector<8x16xf32>
    %cst_18 = arith.constant dense<0.000000e+00> : vector<8x16xf32>
    %60 = tpu.matmul %8, %0, %cst_18 {dimension_numbers = #tpu.dot_dimension_numbers<[1], [1], [0], [0], [0, 0, 1, 0], [], []>} : vector<8x8xf32>, vector<16x8xf32>, vector<8x16xf32> -> vector<8x16xf32>
    %61 = arith.mulf %8, %8 : vector<8x8xf32>
    %cst_19 = arith.constant dense<0.000000e+00> : vector<8xf32>
    %62 = vector.multi_reduction <add>, %61, %cst_19 [1] : vector<8x8xf32> to vector<8xf32>
    %63 = vector.shape_cast %62 : vector<8xf32> to vector<8x1xf32>
    %c0_20 = arith.constant 0 : index
    %c0_21 = arith.constant 0 : index
    %64 = vector.load %arg7[%c0_20, %c0_21] : memref<1x16xf32, #tpu.memory_space<vmem>>, vector<1x16xf32>
    %65 = vector.broadcast %63 : vector<8x1xf32> to vector<8x16xf32>
    %66 = vector.broadcast %64 : vector<1x16xf32> to vector<8x16xf32>
    %67 = arith.mulf %65, %66 : vector<8x16xf32>
    %cst_22 = arith.constant 1.000000e-16 : f32
    %68 = vector.broadcast %cst_22 : f32 to vector<8x16xf32>
    %69 = arith.maximumf %67, %68 : vector<8x16xf32>
    %70 = math.rsqrt %69 : vector<8x16xf32>
    %71 = arith.mulf %60, %70 : vector<8x16xf32>
    %72 = vector.broadcast %23 : vector<8x1xf32> to vector<8x16xf32>
    %73 = arith.mulf %72, %71 : vector<8x16xf32>
    %cst_23 = arith.constant dense<0xFF800000> : vector<8xf32>
    %74 = vector.multi_reduction <maximumf>, %73, %cst_23 [1] : vector<8x16xf32> to vector<8xf32>
    %cst_24 = arith.constant 0xFF800000 : f32
    %75 = vector.broadcast %cst_24 : f32 to vector<8xf32>
    %76 = arith.maximumf %75, %74 : vector<8xf32>
    %77 = vector.shape_cast %76 : vector<8xf32> to vector<8x1xf32>
    %78 = vector.broadcast %77 : vector<8x1xf32> to vector<8x16xf32>
    %79 = arith.subf %73, %78 : vector<8x16xf32>
    %80 = math.exp %79 : vector<8x16xf32>
    %cst_25 = arith.constant dense<0.000000e+00> : vector<8xf32>
    %81 = vector.multi_reduction <add>, %80, %cst_25 [1] : vector<8x16xf32> to vector<8xf32>
    %82 = vector.shape_cast %81 : vector<8xf32> to vector<8x1xf32>
    %83 = vector.broadcast %82 : vector<8x1xf32> to vector<8x16xf32>
    %84 = arith.divf %80, %83 : vector<8x16xf32>
    %85 = vector.broadcast %29 : vector<8x1xf32> to vector<8x16xf32>
    %86 = arith.mulf %85, %84 : vector<8x16xf32>
    %cst_26 = arith.constant 1.000000e+00 : f32
    %87 = vector.broadcast %cst_26 : f32 to vector<8x1xf32>
    %88 = arith.subf %87, %29 : vector<8x1xf32>
    %89 = vector.broadcast %88 : vector<8x1xf32> to vector<8x16xf32>
    %90 = arith.mulf %89, %59 : vector<8x16xf32>
    %91 = arith.addf %86, %90 : vector<8x16xf32>
    %92 = vector.extract_strided_slice %91 {offsets = [0, 15], sizes = [8, 1], strides = [1, 1]} : vector<8x16xf32> to vector<8x1xf32>
    %93 = vector.extract_strided_slice %91 {offsets = [0, 0], sizes = [8, 15], strides = [1, 1]} : vector<8x16xf32> to vector<8x15xf32>
    %94 = tpu.concatenate %92, %93 in 1 : vector<8x1xf32>, vector<8x15xf32> -> vector<8x16xf32>
    %95 = vector.extract_strided_slice %91 {offsets = [0, 1], sizes = [8, 15], strides = [1, 1]} : vector<8x16xf32> to vector<8x15xf32>
    %96 = vector.extract_strided_slice %91 {offsets = [0, 0], sizes = [8, 1], strides = [1, 1]} : vector<8x16xf32> to vector<8x1xf32>
    %97 = tpu.concatenate %95, %96 in 1 : vector<8x15xf32>, vector<8x1xf32> -> vector<8x16xf32>
    %98 = vector.extract_strided_slice %41 {offsets = [0, 0], sizes = [8, 1], strides = [1, 1]} : vector<8x3xf32> to vector<8x1xf32>
    %99 = vector.broadcast %98 : vector<8x1xf32> to vector<8x16xf32>
    %100 = arith.mulf %99, %94 : vector<8x16xf32>
    %101 = vector.extract_strided_slice %41 {offsets = [0, 1], sizes = [8, 1], strides = [1, 1]} : vector<8x3xf32> to vector<8x1xf32>
    %102 = vector.broadcast %101 : vector<8x1xf32> to vector<8x16xf32>
    %103 = arith.mulf %102, %91 : vector<8x16xf32>
    %104 = arith.addf %100, %103 : vector<8x16xf32>
    %105 = vector.extract_strided_slice %41 {offsets = [0, 2], sizes = [8, 1], strides = [1, 1]} : vector<8x3xf32> to vector<8x1xf32>
    %106 = vector.broadcast %105 : vector<8x1xf32> to vector<8x16xf32>
    %107 = arith.mulf %106, %97 : vector<8x16xf32>
    %108 = arith.addf %104, %107 : vector<8x16xf32>
    %cst_27 = arith.constant 1.000000e-16 : f32
    %109 = vector.broadcast %cst_27 : f32 to vector<8x16xf32>
    %110 = arith.addf %108, %109 : vector<8x16xf32>
    %111 = math.log %110 : vector<8x16xf32>
    %112 = vector.broadcast %58 : vector<8x1xf32> to vector<8x16xf32>
    %113 = arith.mulf %112, %111 : vector<8x16xf32>
    %114 = math.exp %113 : vector<8x16xf32>
    %cst_28 = arith.constant dense<0.000000e+00> : vector<8xf32>
    %115 = vector.multi_reduction <add>, %114, %cst_28 [1] : vector<8x16xf32> to vector<8xf32>
    %116 = vector.shape_cast %115 : vector<8xf32> to vector<8x1xf32>
    %cst_29 = arith.constant 1.000000e-16 : f32
    %117 = vector.broadcast %cst_29 : f32 to vector<8x1xf32>
    %118 = arith.addf %116, %117 : vector<8x1xf32>
    %119 = tpu.reciprocal %118 : vector<8x1xf32> -> vector<8x1xf32>
    %120 = vector.broadcast %119 : vector<8x1xf32> to vector<8x16xf32>
    %121 = arith.mulf %114, %120 : vector<8x16xf32>
    %cst_30 = arith.constant dense<0.000000e+00> : vector<8x8xf32>
    %122 = tpu.matmul %121, %0, %cst_30 {dimension_numbers = #tpu.dot_dimension_numbers<[1], [0], [0], [1], [0, 0, 1, 1], [], []>} : vector<8x16xf32>, vector<16x8xf32>, vector<8x8xf32> -> vector<8x8xf32>
    %c0_31 = arith.constant 0 : index
    %c0_32 = arith.constant 0 : index
    %123 = vector.load %arg6[%c0_31, %c0_32] : memref<8x16xf32, #tpu.memory_space<vmem>>, vector<8x16xf32>
    tpu.vector_store %arg6[%c0_31, %c0_32], %121 {strides = array<i32>} : memref<8x16xf32, #tpu.memory_space<vmem>>, vector<8x16xf32>,
    %124 = tpu.concatenate %122, %121 in 1 : vector<8x8xf32>, vector<8x16xf32> -> vector<8x24xf32>
    %c0_33 = arith.constant 0 : index
    %c0_34 = arith.constant 0 : index
    %c0_35 = arith.constant 0 : index
    %125 = vector.load %arg5[%c0_33, %c0_34, %c0_35] : memref<1x8x24xf32, #tpu.memory_space<vmem>>, vector<1x8x24xf32>
    %126 = vector.shape_cast %125 : vector<1x8x24xf32> to vector<8x24xf32>
    %127 = vector.shape_cast %124 : vector<8x24xf32> to vector<1x8x24xf32>
    tpu.vector_store %arg5[%c0_33, %c0_34, %c0_35], %127 {strides = array<i32>} : memref<1x8x24xf32, #tpu.memory_space<vmem>>, vector<1x8x24xf32>,
    return
  }
  func.func @transform_0(%arg0: i32) -> (i32, i32, i32) {
    %c0_i32 = arith.constant 0 : i32
    %c0_i32_0 = arith.constant 0 : i32
    %c0_i32_1 = arith.constant 0 : i32
    return %arg0, %c0_i32, %c0_i32_0 : i32, i32, i32
  }
  func.func @transform_1(%arg0: i32) -> (i32, i32) {
    %c0_i32 = arith.constant 0 : i32
    %c0_i32_0 = arith.constant 0 : i32
    %c0_i32_1 = arith.constant 0 : i32
    return %c0_i32, %c0_i32_0 : i32, i32
  }
  func.func @transform_2(%arg0: i32) -> (i32, i32) {
    %c0_i32 = arith.constant 0 : i32
    %c0_i32_0 = arith.constant 0 : i32
    %c0_i32_1 = arith.constant 0 : i32
    return %c0_i32, %c0_i32_0 : i32, i32
  }
  func.func @transform_3(%arg0: i32) -> (i32, i32) {
    %c0_i32 = arith.constant 0 : i32
    %c0_i32_0 = arith.constant 0 : i32
    %c0_i32_1 = arith.constant 0 : i32
    return %c0_i32, %c0_i32_0 : i32, i32
  }
  func.func @transform_4(%arg0: i32) -> (i32, i32, i32) {
    %c0_i32 = arith.constant 0 : i32
    %c0_i32_0 = arith.constant 0 : i32
    %c0_i32_1 = arith.constant 0 : i32
    return %arg0, %c0_i32, %c0_i32_0 : i32, i32, i32
  }
}

</mosaic_0001>

<bundles_post_ra>
// kernel: tpu_custom_call.1
= control target key start
LH: loop header
LB: loop body
LE: loop exit
PB: predicated region body
PF: predicated region fallthrough
CT: control target
= control target key end

     0   :  { %9 = vsyncpa [#allocation5], 0  ;;  %s1122_s0 = inlined_call_operand.vmem [shape: f32[8,8,33], index: 0, kind: input, shape index: {}]   ;;  %s1123_s1 = inlined_call_operand.vmem [shape: f32[33,14], index: 1, kind: input, shape index: {}]   ;;  %s1124_s2 = inlined_call_operand.vmem [shape: f32[16,8], index: 2, kind: input, shape index: {}]   ;;  %s1125_s3 = inlined_call_operand.vmem [shape: f32[8,16], index: 3, kind: input, shape index: {}]   ;;  %s1126_s4 = inlined_call_operand.hbm [shape: f32[8,8,24], index: 4, kind: output, shape index: {}]  }
   0x1   :  { %11 = vsyncpa [#allocation5 + $0x1], 0  ;;  %s966_s15 = smov 0   ;;  %s968_s16 = smov 0  }
   0x2   :  { %s970_s17 = smov 0   ;;  %s972_s18 = smov 0  }
   0x3 LB: > { %s987_s19 = sadd.s32 4294967295, %s923_s18   ;;  %s704_s20 = sadd.s32 4294967294, %s923_s18   ;;  %s923_s18 = sphi %s972_s18, %s1132_s18   ;;  %s919_s17 = sphi %s970_s17, %s1131_s17   ;;  %s915_s16 = sphi %s968_s16, %s1130_s16   ;;  %s911_s15 = sphi %s966_s15, %s1129_s15  }
   0x4   : > { %s991_s21 = sadd.s32 1, %s923_s18   ;;  %s113_s22 = sadd.s32 1, %s919_s17 }
   0x5   : > { %s110_s23 = ssub.s32 %s923_s18, %s991_s21  ;;  %p123_p0 = scmp.ne.s32.totalorder %s919_s17, %s915_s16 }
   0x6   : > { %p111_p1 = scmp.eq.s32.totalorder %s110_s23, 0  ;;  %p124_p2 = scmp.eq.s32.totalorder %s987_s19, 7 }
   0x7   : > { %p129_p3 = scmp.ne.s32.totalorder %s915_s16, %s911_s15  ;;  %p130_p4 = scmp.eq.s32.totalorder %s704_s20, 7 }
   0x8   : > { %s1002_s24 = scalar_select %p111_p1, %s919_s17, %s113_s22  }
   0x9   : > { %p1004_p5 = por %p124_p2, %p123_p0  ;;  %p1008_p6 = por %p130_p4, %p129_p3 }
   0xa   : > { %p707_p7 = scmp.ge.s32.totalorder %s923_s18, 1  ;;  %p164_p8 = scmp.lt.s32.totalorder %s923_s18, 9 }
   0xc   : > { %p165_p9 = pnand %p707_p7, %p164_p8 }
   0xd   : > { %s186_s27 = sand.u32 (!%p165_p9), 1, %s915_s16   ;;  %p189_p10 = scmp.lt.s32.totalorder (!%p165_p9), %s987_s19, 7  ;;  %v193_v0 = vld [vmem:[%s1124_s2] sm:$0xff] (!%p165_p9)  ;;  %v194_v1 = vld [vmem:[%s1124_s2 + $0x8] sm:$0xff] (!%p165_p9) }
   0xe   : > { %168 = sbr.rel (%p165_p9) target bundleno = 1609 (0x649), region = 36  ;;  %s1024_s6 = sshll.u32 (!%p165_p9), %s186_s27, 3 }
   0xf   : > { %s188_s12 = scalar_lea.vmem (!%p165_p9), [#allocation4], %s1024_s6  ;;  %p710_p11 = scmp.ne.s32.totalorder (!%p165_p9), %s987_s19, 0 }
  0x15   : > { %s190_s7 = scalar_select %p189_p10, %s987_s19, 7 }
  0x16   : > { %198 = sbr.rel (%p710_p11) target bundleno = 297 (0x129), region = 40  ;;  %v202_v2 = vmul.f32 (!%p710_p11), %v193_v0, %v193_v0  ;;  %vm204_vm0 = vcmask (!%p710_p11), 64512   ;;  %v203_v3 = vmul.f32 (!%p710_p11), %v194_v1, %v194_v1  ;;  %v199_v7 = vld [vmem:[%s1125_s3] sm:$0xff] (!%p710_p11)  ;;  %vm200_vm1 = vcmask (!%p710_p11), 130048  }
  0x17   : > { %s709_s8 = sshll.u32 %s190_s7, 3  ;;  %201 = vst.msk [vmem:[#allocation2] sm:$0xff] (!%p710_p11), %vm200_vm1, %v199_v7  ;;  %vm243_vm2 = vcmask (!%p710_p11), 122880  }
  0x18   : > { %s1030_s11 = scalar_lea.vmem %s1122_s0, %s709_s8  ;;  %v205_v4 = vsel (!%p710_p11), %vm204_vm0, %v202_v2, 0.0  ;;  %v208_v5 = vsel (!%p710_p11), %vm204_vm0, %v203_v3, 0.0 }
  0x19   : > { %206 = vadd.xlane.f32.xlu0 (!%p710_p11), %v205_v4 }
  0x1d   : > { %209 = vadd.xlane.f32.xlu0 %v208_v5 }
  0xa6   : > { %v207_v6 = vpop.xlane.xlu0 %206 }
  0xa7   : > { %211 = vxpose.xlu1.b32.start [1/2] (short) (narrow) %v207_v6, 8 }
  0xaa   : > { %v210_v8 = vpop.xlane.xlu0 %209 }
  0xab   : > { %212 = vxpose.xlu1.b32.end [2/2] (short) (narrow) %v210_v8, 8 }
 0x127   : > { %v227_v9 = vpop.trf.xlu1 }
 0x128   : > { %244 = vst.msk [vmem:[#allocation3] sm:$0x1] %vm243_vm2, %v227_v9 }
 0x129 PF: > { %v246_v10 = vld [vmem:[%s1123_s1] sm:$0xff]  ;;  %v247_v11 = vld [vmem:[%s1123_s1 + $0x8] sm:$0xff]  ;;  %v248_v12 = vld [vmem:[%s1123_s1 + $0x10] sm:$0xff]  ;;  %v769_v13 = vpack.c.bf16 %v194_v1, %v193_v0  ;;  %v925_v14 = vmov 0.0|0.0   ;;  %vm926_vm3 = vmmov 0   ;;  %v927_v17 = vmov 0.0  }
 0x12a   : > { %762 = vmatprep.subr.bf16.mxu0 %v925_v14  ;;  %v763_v15 = vpack.c.bf16 %v247_v11, %v246_v10  ;;  %v249_v16 = vld [vmem:[%s1123_s1 + $0x18] sm:$0xff]  ;;  %768 = vmatprep.subr.bf16.mxu1 %v925_v14  ;;  %vm372_vm4 = vcmask 64512   ;;  %v250_v19 = vld [vmem:[%s1123_s1 + $0x20] sm:$0x1]  ;;  %vm255_vm6 = vcmask 1040384   ;;  %vm251_vm7 = vcmask 269312  }
 0x12b   : > { %745 = vmatprep.mubr.msk.f32.mxu0 %vm926_vm3, %v927_v17  ;;  %752 = vmatprep.mubr.msk.f32.mxu1 %vm926_vm3, %v927_v17  ;;  %v766_v18 = vpack.c.bf16 %v249_v16, %v248_v12  ;;  %vm770_vm5 = vmpackc.low %vm372_vm4, %vm372_vm4  ;;  %v245_v20 = vld [vmem:[%s1030_s11] sm:$0xff]  ;;  %v928_v21 = vmov 8   ;;  %vm353_vm8 = vcmask 105552   ;;  %vm473_vm11 = vcmask 130048   ;;  %s929_s10 = smov 118   ;;  %s935_s11 = smov 113  }
 0x12c   : > { %764 = vmatpush3.bf16.msra.mxu0 %v763_v15  ;;  %771 = vmatpush3.bf16.xpose.msk.msra.mxu1 %vm770_vm5, %v769_v13  ;;  %v930_v57 = vmov 9   ;;  %vm364_vm12 = vcmask 23552   ;;  %v931_v6 = vmov 10   ;;  %v932_v7 = vmov 11   ;;  %v371_v16 = vld [vmem:[#allocation2] sm:$0xff]  ;;  %s936_s13 = smov 1  }
 0x12d   : > { %765 = vmatprep.subr.bf16.mxu0 %v925_v14  ;;  %772 = vmatprep.subr.bf16.mxu1 %v925_v14  ;;  %v934_v14 = vmov 13   ;;  %s937_s14 = smov 127   ;;  %s938_s20 = smov 15   ;;  %vm506_vm13 = vcmask 7168   ;;  %vm514_vm14 = vcmask 121856   ;;  %vm629_vm15 = vcmask 195584  }
 0x12e   : > { %830 = vset.pattern.permute.xlu0 %v928_v21  ;;  %831 = vset.pattern.permute.xlu1 %v930_v57  ;;  %s939_s22 = smov 8   ;;  %s720_s23 = sshll.u32 %s987_s19, 7 }
 0x12f   : > { %v717_v42 = vld [vmem:[#allocation3] ss:$0 sm:$0xff]  ;;  %s645_s28 = sshll.u32 %s188_s12, 4  ;;  %s1075_s5 = scalar_lea.hbm %s1126_s4, %s720_s23  ;;  %s1077_s28 = int_to_ptr.vmem [resolvable:$true] %s645_s28 }
 0x130   : > { %767 = vmatpush3.bf16.msra.mxu0 %v766_v18  ;;  %s632_s19 = scalar_lea.sflag [#allocation5], %s186_s27  ;;  %s861_s7 = scalar_lea.vmem %s1077_s28, 128 }
 0x131   : > { %743 = vmatprep.subr.mxu0 %v927_v17  ;;  %p862_p12 = scmp.ne.s32.totalorder %s1077_s28, %s861_s7  ;;  %s940_s8 = smov [#allocation4]  }
 0x132   : > { %s865_s9 = sshll.u32 %s940_s8, 4  ;;  %s866_s9 = int_to_ptr.vmem [resolvable:$false] %s865_s9 }
 0x133   : > { %p863_p13 = pnand %p862_p12, %p1004_p5  ;;  %p868_p1 = scmp.lt.s32.totalorder %s1077_s28, %s866_s9 }
 0x134   : > { %744 = vmatpush3.msk.msra.mxu0 %vm255_vm6, %v250_v19 }
 0x135   : > { %746 = vmatmul.mubr.msk.f32.vlgmr.msra.gmra.mrb[0].mxu0 %vm251_vm7, %v245_v20  ;;  %p864_p0 = pneg %p863_p13 }
 0x208   : > { %v325_v22 = vpop.f32.mrb[0].mxu0 }
 0x209   : > { %v332_v23 = vand.u32 2147483647, %v325_v22  ;;  %v747_v24 = vpop.f32.mrb[1].mxu0  ;;  %753 = vmatmul.mubr.msk.f32.vlgmr.msra.gmra.mrb[0].mxu1 %vm372_vm4, %v325_v22  ;;  %v354_v25 = vsel %vm353_vm8, %v325_v22, -inf  ;;  %v452_v26 = vmul.f32 %v325_v22, %v325_v22  ;;  %v329_v38 = vmax.f32 %v325_v22, 0.0 }
 0x20a   : > { %355 = vmax.xlane.f32.xlu1 %v354_v25  ;;  %774 = vmatpush3.bf16.msra.mxu1 %v769_v13  ;;  %vm330_vm10 = vcmp.ne.f32.partialorder %v325_v22, %v325_v22  ;;  %v713_v58 = vmul.f32 -1.442695, %v325_v22  ;;  %v933_v13 = vmov 12  }
 0x20b   : > { %v333_v27 = vsub.f32 0.0, %v332_v23  ;;  %v453_v28 = vsel %vm372_vm4, %v452_v26, 0.0  ;;  %759 = vmatprep.mubr.msk.f32.mxu1 %vm926_vm3, %v927_v17 }
 0x20c   : > { %454 = vadd.xlane.f32.xlu0 %v453_v28 }
 0x20d   : > { %v334_v29 = vmul.f32 1.442695, %v333_v27 }
 0x20f   : > { %837 = vpow2.f32 %v334_v29 }
 0x219   : > { %v838_v30 = vpop.eup %837 }
 0x21a   : > { %v336_v31 = vadd.f32 1.0, %v838_v30  ;;  %v339_v32 = vmul.f32 -0.5, %v838_v30  ;;  %v342_v34 = vand.u32 2147483647, %v838_v30 }
 0x21c   : > { %839 = vlog2.f32 %v336_v31  ;;  %v340_v33 = vadd.f32 1.0, %v339_v32  ;;  %vm343_vm9 = vcmp.lt.f32.partialorder %v342_v34, 0.0004427343 }
 0x21e   : > { %v341_v37 = vmul.f32 %v838_v30, %v340_v33 }
 0x226   : > { %v840_v35 = vpop.eup %839 }
 0x227   : > { %v338_v36 = vmul.f32 0.6931472, %v840_v35 }
 0x229   : > { %v344_v39 = vsel %vm343_vm9, %v341_v37, %v338_v36 }
 0x22a   : > { %v345_v40 = vadd.f32 %v344_v39, %v329_v38 }
 0x22c   : > { %v1060_v41 = vsel %vm330_vm10, %v325_v22, %v345_v40 }
 0x22d   : > { %469 = vperm.xlu0 %830, %v1060_v41  }
 0x231   : > { %832 = vset.pattern.permute.xlu0 %v931_v6 }
 0x297   : > { %v356_v48 = vpop.xlane.xlu1 %355 }
 0x298   : > { %v357_v53 = vsub.f32 %v325_v22, %v356_v48  ;;  %v370_v22 = vadd.f32 1.0, %v1060_v41 }
 0x299   : > { %v455_v43 = vpop.xlane.xlu0 %454 }
 0x29a   : > { %v463_v44 = vmul.f32 %v717_v42, %v455_v43  ;;  %v358_v55 = vmul.f32 1.442695, %v357_v53 }
 0x29c   : > { %v464_v45 = vmax.f32 %v463_v44, 1e-16 }
 0x29e   : > { %841 = vrsqrt.f32 %v464_v45 }
 0x29f   : > { %843 = vpow2.f32 %v358_v55 }
 0x2a0   : > { %845 = vpow2.f32 %v713_v58 }
 0x2a8   : > { %v842_v46 = vpop.eup %841 }
 0x2a9   : > { %v844_v56 = vpop.eup %843 }
 0x2aa   : > { %v846_v63 = vpop.eup %845 }
 0x2ab   : > { %v350_v1 = vadd.f32 1.0, %v846_v63 }
 0x2ac   : > { %v470_v51 = vpop.permute.xlu0 %469 }
 0x2dc   : > { %v448_v47 = vpop.f32.mrb[0].mxu1 }
 0x2dd   : > { %v466_v49 = vmul.f32 %v842_v46, %v448_v47  ;;  %v754_v50 = vpop.f32.mrb[1].mxu1 }
 0x2df   : > { %v472_v52 = vmul.f32 %v470_v51, %v466_v49 }
 0x2e1   : > { %v474_v54 = vsel %vm473_vm11, %v472_v52, -inf }
 0x2e2   : > { %475 = vmax.xlane.f32.xlu1 %v474_v54 }
 0x2f3   : > { %361 = vrot.lane.b32.xlu1 %v844_v56, %s929_s10  ;;  %s867_s10 = scalar_lea.vmem %s866_s9, 256 }
 0x2f4   : > { %p869_p2 = scmp.lt.s32.totalorder %s867_s10, %s861_s7 }
 0x2f6   : > { %p870_p3 = por %p869_p2, %p868_p1 }
 0x2f8   : > { %p871_p4 = pnand %p870_p3, %p864_p0 }
 0x36f   : > { %v476_v59 = vpop.xlane.xlu1 %475 }
 0x370   : > { %v477_v60 = vsub.f32 %v472_v52, %v476_v59 }
 0x372   : > { %v478_v61 = vmul.f32 1.442695, %v477_v60 }
 0x373   : > { %v362_v62 = vpop.permute.xlu1 %361 }
 0x374   : > { %847 = vpow2.f32 %v478_v61  ;;  %v365_v0 = vsel %vm364_vm12, %v362_v62, 0.0 }
 0x375   : > { %366 = vadd.xlane.f32.xlu1 %v365_v0  ;;  %849 = vrcp.f32 %v350_v1 }
 0x37e   : > { %v848_v2 = vpop.eup %847 }
 0x37f   : > { %v480_v3 = vsel %vm473_vm11, %v848_v2, 0.0  ;;  %v850_v4 = vpop.eup %849 }
 0x380   : > { %481 = vadd.xlane.f32.xlu0 %v480_v3  ;;  %v491_v5 = vsub.f32 1.0, %v850_v4 }
 0x386   : > { %487 = vperm.xlu1 %831, %v850_v4  }
 0x38a   : > { %494 = vperm.xlu1 %831, %v491_v5  }
 0x38e   : > { %833 = vset.pattern.permute.xlu1 %v932_v7 }
 0x402   : > { %v367_v8 = vpop.xlane.xlu1 %366 }
 0x403   : > { %851 = vrcp.f32 %v367_v8 }
 0x406   : > { %v488_v12 = vpop.permute.xlu1 %487 }
 0x40a   : > { %v495_v17 = vpop.permute.xlu1 %494 }
 0x40b   : > { %v497_v19 = vmul.f32 %v495_v17, %v371_v16 }
 0x40d   : > { %v852_v9 = vpop.eup %851  ;;  %v482_v10 = vpop.xlane.xlu0 %481 }
 0x40e   : > { %853 = vrcp.f32 %v482_v10  ;;  %v369_v11 = vmul.f32 %v852_v9, %v844_v56 }
 0x410   : > { %523 = vperm.xlu1 %833, %v369_v11   ;;  %518 = vperm.xlu0 %832, %v369_v11  }
 0x414   : > { %834 = vset.pattern.permute.xlu1 %v933_v13  ;;  %836 = vset.pattern.permute.xlu0 %v934_v14 }
 0x415   : > { %529 = vperm.xlu1 %834, %v369_v11  }
 0x418   : > { %v854_v15 = vpop.eup %853 }
 0x419   : > { %v484_v18 = vmul.f32 %v854_v15, %v848_v2  ;;  %835 = vset.pattern.permute.xlu1 %v934_v14 }
 0x41b   : > { %v490_v20 = vmul.f32 %v488_v12, %v484_v18 }
 0x41d   : > { %v498_v21 = vadd.f32 %v497_v19, %v490_v20 }
 0x41f   : > { %500 = vrot.lane.b32.xlu1 %v498_v21, %s935_s11 }
 0x423   : > { %503 = vrot.lane.b32.xlu1 %v498_v21, %s936_s13 }
 0x427   : > { %508 = vrot.lane.b32.xlu1 %v498_v21, %s937_s14 }
 0x42b   : > { %511 = vrot.lane.b32.xlu1 %v498_v21, %s938_s20 }
 0x42f   : > { %539 = vperm.xlu1 %835, %v370_v22  }
 0x48f   : > { %v524_v23 = vpop.permute.xlu1 %523  ;;  %v519_v29 = vpop.permute.xlu0 %518 }
 0x490   : > { %v526_v31 = vmul.f32 %v524_v23, %v498_v21 }
 0x494   : > { %v530_v24 = vpop.permute.xlu1 %529 }
 0x498   : > { %v501_v25 = vpop.permute.xlu1 %500 }
 0x49c   : > { %v504_v26 = vpop.permute.xlu1 %503 }
 0x49d   : > { %v507_v27 = vsel %vm506_vm13, %v501_v25, %v504_v26 }
 0x49e   : > { %v521_v30 = vmul.f32 %v519_v29, %v507_v27 }
 0x4a0   : > { %v509_v28 = vpop.permute.xlu1 %508  ;;  %v527_v34 = vadd.f32 %v526_v31, %v521_v30 }
 0x4a4   : > { %v512_v32 = vpop.permute.xlu1 %511 }
 0x4a5   : > { %v515_v33 = vsel %vm514_vm14, %v509_v28, %v512_v32 }
 0x4a6   : > { %v532_v35 = vmul.f32 %v530_v24, %v515_v33 }
 0x4a8   : > { %v533_v36 = vadd.f32 %v532_v35, %v527_v34 }
 0x4aa   : > { %v534_v37 = vadd.f32 1e-16, %v533_v36 }
 0x4ac   : > { %855 = vlog2.f32 %v534_v37 }
 0x4ae   : > { %v540_v40 = vpop.permute.xlu1 %539 }
 0x4b6   : > { %v856_v38 = vpop.eup %855 }
 0x4b7   : > { %v536_v39 = vmul.f32 0.6931472, %v856_v38 }
 0x4b9   : > { %v542_v41 = vmul.f32 %v540_v40, %v536_v39 }
 0x4bb   : > { %v543_v42 = vmul.f32 1.442695, %v542_v41 }
 0x4bd   : > { %857 = vpow2.f32 %v543_v42 }
 0x4c7   : > { %v858_v43 = vpop.eup %857 }
 0x4c8   : > { %v545_v44 = vsel %vm473_vm11, %v858_v43, 0.0 }
 0x4c9   : > { %546 = vadd.xlane.f32.xlu1 %v545_v44 }
 0x556   : > { %v547_v45 = vpop.xlane.xlu1 %546 }
 0x557   : > { %v548_v46 = vadd.f32 1e-16, %v547_v45 }
 0x559   : > { %859 = vrcp.f32 %v548_v46 }
 0x563   : > { %v860_v47 = vpop.eup %859 }
 0x564   : > { %v550_v48 = vmul.f32 %v860_v47, %v858_v43 }
 0x566   : > { %625 = vrot.lane.b32.xlu0 %v550_v48, %s939_s22  ;;  %624 = vst.msk [vmem:[#allocation2] sm:$0xff] %vm473_vm11, %v550_v48  ;;  %760 = vmatmul.mubr.msk.f32.vlgmr.msra.gmra.mrb[2].mxu1 %vm473_vm11, %v550_v48 }
 0x5d8   : > { %v626_v49 = vpop.permute.xlu0 %625 }
 0x639   : > { %v620_v50 = vpop.f32.mrb[2].mxu1 }
 0x63a   : > { %v628_v51 = vsel %vm372_vm4, %v620_v50, %v626_v49  ;;  %v761_v52 = vpop.f32.mrb[3].mxu1 }
 0x63b   : > { %630 = vst.msk [vmem:[%s188_s12] sm:$0xff] %vm629_vm15, %v628_v51 }
 0x63c   : > { %874 = shalt.err (!%p871_p4)
}
 0x63d   : > { %s875_s27 = scalar_lea.hbm %s1075_s5, 128  ;;  %s879_s11 = scalar_lea.hbm %s1126_s4, 1024 }
 0x63e   : > { %p876_p7 = scmp.ne.s32.totalorder %s1075_s5, %s875_s27  ;;  %p880_p10 = scmp.lt.u32.totalorder %s1075_s5, %s1126_s4 }
 0x63f   : > { %p881_p11 = scmp.lt.u32.totalorder %s879_s11, %s875_s27  ;;  %p883_p13 = scmp.lt.u32.totalorder %s875_s27, %s1075_s5 }
 0x640   : > { %p877_p8 = pnand %p876_p7, %p1004_p5 }
 0x641   : > { %p882_p12 = por %p881_p11, %p880_p10 }
 0x642   : > { %p878_p9 = pneg %p877_p8 }
 0x643   : > { %p884_p0 = por %p883_p13, %p882_p12 }
 0x645   : > { %p885_p1 = pnand %p884_p0, %p878_p9 }
 0x647   : > { %888 = shalt.err (!%p885_p1)
}
 0x648   : > { %775 = dma.vmem_to_hbm [thread:$0]  (%p1004_p5), %s1077_s28, 128, %s1075_s5, %s632_s19  }
 0x649 PF: > { %p781_p2 = scmp.ge.s32.totalorder %s923_s18, 2  ;;  %s657_s20 = sand.u32 1, %s911_s15  }
 0x64a   : > { %s658_s22 = scalar_lea.sflag [#allocation5], %s657_s20 }
 0x64b   : > { %p778_p3 = pnand %p781_p2, %p1008_p6 }
 0x64d   : > { %906 = dma.done.wait (!%p778_p3), %s658_s22, 128  }
 0x64e   : > { %908 = vsyncadd (!%p778_p3), %s658_s22, 4294967168  ;;  %p14_p4 = scmp.ge.s32.totalorder %s991_s21, 10   ;;  %s1129_s15 = smov %s915_s16 }
 0x64f   : > { %s1130_s16 = smov %s919_s17  ;;  %s1131_s17 = smov %s1002_s24 }
 0x650   : > { %s1132_s18 = smov %s991_s21  ;;  %16 = sbr.rel (!%p14_p4) target bundleno = 3 (0x3), region = 75 }
 0x657   :  { %663 = vsyncpa [#allocation5], 1 }
 0x658   :  { %665 = vsyncpa [#allocation5 + $0x1], 1 }

</bundles_post_ra>
